<compile_context>
chip_gen: v7x
topology: tpu7x:2x2x1
jax: 0.10.0
libtpu: 0.0.40
codegen_flags: <defaults>
</compile_context>

<pallas_src>
import functools

import jax
import jax.numpy as jnp
from jax.experimental import pallas as pl
from jax.experimental.pallas import tpu as pltpu


def _se_kernel(x_ref, w1t_ref, b1_ref, w2t_ref, b2_ref, o_ref, *,
               channels_on_lanes: bool, inv_hw: float):
    # x_ref block: (bn, HW, C) if channels_on_lanes else (bn, C, HW)
    reduce_axis = 1 if channels_on_lanes else 2

    # --- squeeze: global average pool over spatial axis, f32 accumulation ---
    pooled = jnp.sum(x_ref[...], axis=reduce_axis, dtype=jnp.float32) * inv_hw  # (bn, C)

    # --- excitation: fc1 (1x1 conv) + relu ---
    h = jnp.dot(pooled, w1t_ref[...],
                preferred_element_type=jnp.float32) + b1_ref[...]        # (bn, mid)
    h = jnp.maximum(h, 0.0)

    # --- fc2 (1x1 conv) + sigmoid ---
    a = jnp.dot(h, w2t_ref[...],
                preferred_element_type=jnp.float32) + b2_ref[...]        # (bn, C)
    a = jax.nn.sigmoid(a).astype(o_ref.dtype)

    # --- scale: re-index x_ref (stream the tile from VMEM again) rather than
    #     reusing the value captured before the pool/matmuls ---
    if channels_on_lanes:
        alpha = a[:, None, :]          # broadcast over HW sublanes; lanes = C
    else:
        alpha = a[:, :, None]          # broadcast over HW lanes; sublanes = C
    o_ref[...] = (x_ref[...] * alpha).astype(o_ref.dtype)


def _device_vmem_capacity_bytes():
    try:
        return int(pltpu.get_tpu_info().vmem_capacity_bytes)
    except Exception:
        return 64 * 1024 * 1024   # conservative fallback (v7x per-TensorCore VMEM)


def se_module(x, w1, b1, w2, b2, *, block_n=None):
    """x: (N, C, H, W); w1: (mid, C) = fc1.weight[:,:,0,0]; b1: (mid,);
    w2: (C, mid) = fc2.weight[:,:,0,0]; b2: (C,)."""
    N, C, H, W = x.shape
    mid = w1.shape[0]
    HW = H * W

    # Lane-axis selection: keep lane = HW only when it is already lane-dense.
    channels_on_lanes = not (HW >= 128 and HW % 128 == 0)

    if channels_on_lanes:
        x2 = jnp.transpose(x.reshape(N, C, HW), (0, 2, 1))   # (N, HW, C), lane = C
        blk_tail = (HW, C)
    else:
        x2 = x.reshape(N, C, HW)                              # (N, C, HW), lane = HW
        blk_tail = (C, HW)

    # Pre-transpose weights, 2-D biases.
    w1t = jnp.transpose(w1)            # (C, mid)
    w2t = jnp.transpose(w2)            # (mid, C)
    b1r = b1.reshape(1, mid)
    b2r = b2.reshape(1, C)

    itemsize = jnp.dtype(x.dtype).itemsize
    w_itemsize = jnp.dtype(w1.dtype).itemsize
    bytes_per_sample = C * HW * itemsize

    # Generation-aware VMEM sizing.  `budget` covers 2 double-buffered input
    # blocks + 2 output blocks; `vmem_limit` is derived from actual usage.
    vmem_cap = _device_vmem_capacity_bytes()
    limit_cap = min(vmem_cap * 3 // 4, 100 * 1024 * 1024)   # ~96 MiB v5e/v6e, ~48 MiB v7x
    budget = limit_cap // 2

    if block_n is not None:
        bn = max(1, min(N, int(block_n)))
    else:
        bn_cap = max(1, budget // max(1, 4 * bytes_per_sample))
        target_steps = min(N, 4)                     # >=4 steps when N allows
        bn = max(1, min(N, bn_cap, pl.cdiv(N, target_steps)))
        # Prefer an even number of grid steps (v7x: two TensorCores share the grid).
        if bn > 1 and pl.cdiv(N, bn) % 2 != 0:
            bn_even = bn - 1
            while bn_even > 1 and pl.cdiv(N, bn_even) % 2 != 0:
                bn_even -= 1
            if pl.cdiv(N, bn_even) % 2 == 0:
                bn = bn_even
    grid = (pl.cdiv(N, bn),)

    weight_bytes = (2 * C * mid + mid + C) * w_itemsize
    needed = 4 * bn * bytes_per_sample + 4 * weight_bytes
    hard_cap = vmem_cap * 9 // 10
    vmem_limit = max(8 * 1024 * 1024,
                     min(hard_cap, needed + needed // 2 + (4 << 20)))
    # TODO(synk): if a single sample (bn == 1) still exceeds `hard_cap`, add an
    # intra-sample HW-tiled two-pass path (pool+excite pass, then scale pass).

    cost = pl.CostEstimate(
        flops=2 * N * C * HW + 4 * N * C * mid,          # pool+scale, two tiny matmuls
        transcendentals=N * C,                           # sigmoid
        bytes_accessed=2 * N * C * HW * itemsize + weight_bytes,
    )

    kernel = functools.partial(_se_kernel,
                               channels_on_lanes=channels_on_lanes,
                               inv_hw=1.0 / HW)

    out2 = pl.pallas_call(
        kernel,
        out_shape=jax.ShapeDtypeStruct((N,) + blk_tail, x.dtype),
        grid=grid,
        in_specs=[
            pl.BlockSpec((bn,) + blk_tail, lambda n: (n, 0, 0)),
            pl.BlockSpec((C, mid), lambda n: (0, 0)),     # resident weights
            pl.BlockSpec((1, mid), lambda n: (0, 0)),
            pl.BlockSpec((mid, C), lambda n: (0, 0)),
            pl.BlockSpec((1, C), lambda n: (0, 0)),
        ],
        out_specs=pl.BlockSpec((bn,) + blk_tail, lambda n: (n, 0, 0)),
        compiler_params=pltpu.CompilerParams(
            dimension_semantics=("parallel",),
            vmem_limit_bytes=int(vmem_limit),
        ),
        cost_estimate=cost,
    )(x2, w1t, b1r, w2t, b2r)

    if channels_on_lanes:
        return jnp.transpose(out2, (0, 2, 1)).reshape(N, C, H, W)
    return out2.reshape(N, C, H, W)


def se_reference(x, w1, b1, w2, b2):
    """Pure-JAX reference matching the PyTorch module."""
    pooled = jnp.mean(x, axis=(2, 3))                        # (N, C)
    h = jnp.maximum(pooled @ w1.T + b1, 0.0)                 # (N, mid)
    a = jax.nn.sigmoid(h @ w2.T + b2)                        # (N, C)
    return x * a[:, :, None, None]


if __name__ == "__main__":
    key = jax.random.PRNGKey(0)
    r = 16

    # Two small configs: HW=64 exercises the lane=C (channels-last) path,
    # HW=256 (multiple of 128) exercises the lane=HW path.
    for (N, C, H, W) in [(2, 32, 8, 8), (2, 32, 16, 16)]:
        mid = C // r                                          # = 2
        key, kx, k1, k2, k3, k4 = jax.random.split(key, 6)

        x = jax.random.normal(kx, (N, C, H, W), dtype=jnp.float32)
        # Deterministic synthetic parameters (nn.Conv2d 1x1 weights squeezed to 2-D).
        w1 = jax.random.normal(k1, (mid, C), dtype=jnp.float32) * 0.1   # fc1.weight[:, :, 0, 0]
        b1 = jax.random.normal(k2, (mid,), dtype=jnp.float32) * 0.1     # fc1.bias
        w2 = jax.random.normal(k3, (C, mid), dtype=jnp.float32) * 0.1   # fc2.weight[:, :, 0, 0]
        b2 = jax.random.normal(k4, (C,), dtype=jnp.float32) * 0.1       # fc2.bias

        out = jax.block_until_ready(se_module(x, w1, b1, w2, b2))
        ref = se_reference(x, w1, b1, w2, b2)
        assert out.shape == (N, C, H, W)
        assert jnp.allclose(out, ref, atol=1e-5, rtol=1e-5), "mismatch vs reference"

    print("KERNEL_OK")
</pallas_src>

<mosaic_0001>
module attributes {stable_mosaic.version = 11 : i64} {
  func.func @_se_kernel(%arg0: i32, %arg1: memref<1x64x32xf32, #tpu.memory_space<vmem>>, %arg2: memref<32x2xf32, #tpu.memory_space<vmem>>, %arg3: memref<1x2xf32, #tpu.memory_space<vmem>>, %arg4: memref<2x32xf32, #tpu.memory_space<vmem>>, %arg5: memref<1x32xf32, #tpu.memory_space<vmem>>, %arg6: memref<1x64x32xf32, #tpu.memory_space<vmem>>) attributes {dimension_semantics = [#tpu.dimension_semantics<parallel>], iteration_bounds = array<i64: 2>, scalar_prefetch = 0 : i64, scratch_operands = 0 : i64, tpu.core_type = #tpu.core_type<tc>, window_params = [{transform_indices = @transform_0, window_bounds = array<i64: 1, 64, 32>}, {pipeline_mode = #tpu.pipeline_mode<synchronous>, transform_indices = @transform_1, window_bounds = array<i64: 32, 2>}, {pipeline_mode = #tpu.pipeline_mode<synchronous>, transform_indices = @transform_2, window_bounds = array<i64: 1, 2>}, {pipeline_mode = #tpu.pipeline_mode<synchronous>, transform_indices = @transform_3, window_bounds = array<i64: 2, 32>}, {pipeline_mode = #tpu.pipeline_mode<synchronous>, transform_indices = @transform_4, window_bounds = array<i64: 1, 32>}, {transform_indices = @transform_5, window_bounds = array<i64: 1, 64, 32>}]} {
    %c0 = arith.constant 0 : index
    %c0_0 = arith.constant 0 : index
    %c0_1 = arith.constant 0 : index
    %0 = vector.load %arg1[%c0, %c0_0, %c0_1] : memref<1x64x32xf32, #tpu.memory_space<vmem>>, vector<1x64x32xf32>
    %cst = arith.constant dense<0.000000e+00> : vector<1x32xf32>
    %1 = vector.multi_reduction <add>, %0, %cst [1] : vector<1x64x32xf32> to vector<1x32xf32>
    %cst_2 = arith.constant 1.562500e-02 : f32
    %2 = vector.broadcast %cst_2 : f32 to vector<1x32xf32>
    %3 = arith.mulf %1, %2 : vector<1x32xf32>
    %c0_3 = arith.constant 0 : index
    %c0_4 = arith.constant 0 : index
    %4 = vector.load %arg2[%c0_3, %c0_4] : memref<32x2xf32, #tpu.memory_space<vmem>>, vector<32x2xf32>
    %cst_5 = arith.constant dense<0.000000e+00> : vector<1x2xf32>
    %5 = tpu.matmul %3, %4, %cst_5 {dimension_numbers = #tpu.dot_dimension_numbers<[1], [0], [0], [1], [0, 0, 1, 1], [], []>} : vector<1x32xf32>, vector<32x2xf32>, vector<1x2xf32> -> vector<1x2xf32>
    %c0_6 = arith.constant 0 : index
    %c0_7 = arith.constant 0 : index
    %6 = vector.load %arg3[%c0_6, %c0_7] : memref<1x2xf32, #tpu.memory_space<vmem>>, vector<1x2xf32>
    %7 = arith.addf %5, %6 : vector<1x2xf32>
    %cst_8 = arith.constant 0.000000e+00 : f32
    %8 = vector.broadcast %cst_8 : f32 to vector<1x2xf32>
    %9 = arith.maximumf %7, %8 : vector<1x2xf32>
    %c0_9 = arith.constant 0 : index
    %c0_10 = arith.constant 0 : index
    %10 = vector.load %arg4[%c0_9, %c0_10] : memref<2x32xf32, #tpu.memory_space<vmem>>, vector<2x32xf32>
    %cst_11 = arith.constant dense<0.000000e+00> : vector<1x32xf32>
    %11 = tpu.matmul %9, %10, %cst_11 {dimension_numbers = #tpu.dot_dimension_numbers<[1], [0], [0], [1], [0, 0, 1, 1], [], []>} : vector<1x2xf32>, vector<2x32xf32>, vector<1x32xf32> -> vector<1x32xf32>
    %c0_12 = arith.constant 0 : index
    %c0_13 = arith.constant 0 : index
    %12 = vector.load %arg5[%c0_12, %c0_13] : memref<1x32xf32, #tpu.memory_space<vmem>>, vector<1x32xf32>
    %13 = arith.addf %11, %12 : vector<1x32xf32>
    %14 = arith.negf %13 : vector<1x32xf32>
    %15 = math.exp %14 : vector<1x32xf32>
    %cst_14 = arith.constant 1.000000e+00 : f32
    %16 = vector.broadcast %cst_14 : f32 to vector<1x32xf32>
    %17 = arith.addf %16, %15 : vector<1x32xf32>
    %18 = arith.divf %16, %17 : vector<1x32xf32>
    %19 = vector.shape_cast %18 : vector<1x32xf32> to vector<1x1x32xf32>
    %c0_15 = arith.constant 0 : index
    %c0_16 = arith.constant 0 : index
    %c0_17 = arith.constant 0 : index
    %20 = vector.load %arg1[%c0_15, %c0_16, %c0_17] : memref<1x64x32xf32, #tpu.memory_space<vmem>>, vector<1x64x32xf32>
    %21 = vector.broadcast %19 : vector<1x1x32xf32> to vector<1x64x32xf32>
    %22 = arith.mulf %20, %21 : vector<1x64x32xf32>
    %c0_18 = arith.constant 0 : index
    %c0_19 = arith.constant 0 : index
    %c0_20 = arith.constant 0 : index
    %23 = vector.load %arg6[%c0_18, %c0_19, %c0_20] : memref<1x64x32xf32, #tpu.memory_space<vmem>>, vector<1x64x32xf32>
    tpu.vector_store %arg6[%c0_18, %c0_19, %c0_20], %22 {strides = array<i32>} : memref<1x64x32xf32, #tpu.memory_space<vmem>>, vector<1x64x32xf32>,
    return
  }
  func.func @transform_0(%arg0: i32) -> (i32, i32, i32) {
    %c0_i32 = arith.constant 0 : i32
    %c0_i32_0 = arith.constant 0 : i32
    %c0_i32_1 = arith.constant 0 : i32
    return %arg0, %c0_i32, %c0_i32_0 : i32, i32, i32
  }
  func.func @transform_1(%arg0: i32) -> (i32, i32) {
    %c0_i32 = arith.constant 0 : i32
    %c0_i32_0 = arith.constant 0 : i32
    %c0_i32_1 = arith.constant 0 : i32
    return %c0_i32, %c0_i32_0 : i32, i32
  }
  func.func @transform_2(%arg0: i32) -> (i32, i32) {
    %c0_i32 = arith.constant 0 : i32
    %c0_i32_0 = arith.constant 0 : i32
    %c0_i32_1 = arith.constant 0 : i32
    return %c0_i32, %c0_i32_0 : i32, i32
  }
  func.func @transform_3(%arg0: i32) -> (i32, i32) {
    %c0_i32 = arith.constant 0 : i32
    %c0_i32_0 = arith.constant 0 : i32
    %c0_i32_1 = arith.constant 0 : i32
    return %c0_i32, %c0_i32_0 : i32, i32
  }
  func.func @transform_4(%arg0: i32) -> (i32, i32) {
    %c0_i32 = arith.constant 0 : i32
    %c0_i32_0 = arith.constant 0 : i32
    %c0_i32_1 = arith.constant 0 : i32
    return %c0_i32, %c0_i32_0 : i32, i32
  }
  func.func @transform_5(%arg0: i32) -> (i32, i32, i32) {
    %c0_i32 = arith.constant 0 : i32
    %c0_i32_0 = arith.constant 0 : i32
    %c0_i32_1 = arith.constant 0 : i32
    return %arg0, %c0_i32, %c0_i32_0 : i32, i32, i32
  }
}

</mosaic_0001>

<bundles_post_ra>
// kernel: tpu_custom_call.1
= control target key start
LH: loop header
LB: loop body
LE: loop exit
PB: predicated region body
PF: predicated region fallthrough
CT: control target
= control target key end

     0   :  { %s598_s18 = smov 0   ;;  %s660_s0 = inlined_call_operand.vmem [shape: f32[2,64,32], index: 0, kind: input, shape index: {}]   ;;  %s661_s1 = inlined_call_operand.vmem [shape: f32[32,2], index: 1, kind: input, shape index: {}]   ;;  %s662_s2 = inlined_call_operand.vmem [shape: f32[1,2], index: 2, kind: input, shape index: {}]   ;;  %s663_s3 = inlined_call_operand.vmem [shape: f32[2,32], index: 3, kind: input, shape index: {}]   ;;  %s664_s4 = inlined_call_operand.vmem [shape: f32[1,32], index: 4, kind: input, shape index: {}]   ;;  %s665_s5 = inlined_call_operand.vmem [shape: f32[2,64,32], index: 5, kind: output, shape index: {}]  }
   0x1 LB: > { %s496_s19 = sadd.s32 4294967295, %s563_s18   ;;  %p500_p0 = scmp.ge.s32.totalorder %s563_s18, 1  ;;  %s563_s18 = sphi %s598_s18, %s15_s18  }
   0x2   : > { %p187_p1 = scmp.lt.s32.totalorder %s563_s18, 3 }
   0x4   : > { %p188_p2 = pnand %p500_p0, %p187_p1 }
   0x5   : > { %v256_v0 = vld [vmem:[%s661_s1] sm:$0xff] (!%p188_p2)  ;;  %v257_v1 = vld [vmem:[%s661_s1 + $0x8] sm:$0xff] (!%p188_p2)  ;;  %v258_v2 = vld [vmem:[%s661_s1 + $0x10] sm:$0xff] (!%p188_p2)  ;;  %v565_v3 = vmov (!%p188_p2), 0.0|0.0   ;;  %vm566_vm0 = vmmov (!%p188_p2), 0   ;;  %v567_v6 = vmov (!%p188_p2), 0.0   ;;  %v421_v51 = vlaneseq (!%p188_p2) }
   0x6   : > { %191 = sbr.rel (%p188_p2) target bundleno = 510 (0x1fe), region = 40  ;;  %536 = vmatprep.subr.bf16.mxu0 (!%p188_p2), %v565_v3  ;;  %v537_v4 = vpack.c.bf16 (!%p188_p2), %v257_v1, %v256_v0  ;;  %v259_v5 = vld [vmem:[%s661_s1 + $0x18] sm:$0xff] (!%p188_p2)  ;;  %528 = vmatprep.mubr.msk.f32.mxu0 (!%p188_p2), %vm566_vm0, %v567_v6  ;;  %p215_p3 = scmp.lt.s32.totalorder (!%p188_p2), %s496_s19, 1  ;;  %vm233_vm1 = vcmask (!%p188_p2), 261120   ;;  %v335_v38 = vld [vmem:[%s663_s3] sm:$0x3] (!%p188_p2) }
   0x7   : > { %531 = vmatprep.subr.mxu1 (!%p188_p2), %v567_v6  ;;  %533 = vmatprep.mubr.msk.f32.mxu1 (!%p188_p2), %vm566_vm0, %v567_v6  ;;  %v540_v7 = vpack.c.bf16 (!%p188_p2), %v259_v5, %v258_v2  ;;  %vm341_vm2 = vcmask (!%p188_p2), 1041408   ;;  %v260_v39 = vld [vmem:[%s662_s2] sm:$0x1] (!%p188_p2)  ;;  %vm337_vm3 = vcmask (!%p188_p2), 15360   ;;  %v422_v52 = vshrl.u32 (!%p188_p2), %v421_v51, 7 }
   0x8   : > { %538 = vmatpush3.bf16.msra.mxu0 (!%p188_p2), %v537_v4  ;;  %532 = vmatpush3.msk.msra.mxu1 (!%p188_p2), %vm341_vm2, %v335_v38  ;;  %v336_v44 = vld [vmem:[%s664_s4] sm:$0x1] (!%p188_p2) }
   0x9   : > { %539 = vmatprep.subr.bf16.mxu0 (!%p188_p2), %v565_v3  ;;  %v423_v53 = vsub.s32 (!%p188_p2), 0, %v422_v52 }
   0xc   : > { %541 = vmatpush3.bf16.msra.mxu0 (!%p188_p2), %v540_v7 }
   0xd   : > { %s667_s19 = smov (!%p215_p3, %s496_s19), 1 }
   0xe   : > { %s511_s28 = sshll.u32 %s667_s19, 6 }
   0xf   : > { %s219_s6 = scalar_lea.vmem %s660_s0, %s511_s28  ;;  %s224_s15 = scalar_lea.vmem %s665_s5, %s511_s28 }
  0x10   : > { %v225_v8 = vld [vmem:[%s219_s6] sm:$0xff]  ;;  %v226_v9 = vld [vmem:[%s219_s6 + $0x8] sm:$0xff]  ;;  %v227_v10 = vld [vmem:[%s219_s6 + $0x10] sm:$0xff] }
  0x11   : > { %v228_v11 = vld [vmem:[%s219_s6 + $0x18] sm:$0xff]  ;;  %v234_v12 = vsel %vm233_vm1, %v225_v8, 0.0  ;;  %v235_v13 = vsel %vm233_vm1, %v226_v9, 0.0  ;;  %v237_v14 = vsel %vm233_vm1, %v227_v10, 0.0  ;;  %v229_v15 = vld [vmem:[%s219_s6 + $0x20] sm:$0xff]  ;;  %v230_v18 = vld [vmem:[%s219_s6 + $0x28] sm:$0xff] }
  0x12   : > { %v236_v16 = vadd.f32 %v235_v13, %v234_v12  ;;  %v239_v17 = vsel %vm233_vm1, %v228_v11, 0.0  ;;  %v241_v20 = vsel %vm233_vm1, %v229_v15, 0.0  ;;  %v231_v21 = vld [vmem:[%s219_s6 + $0x30] sm:$0xff]  ;;  %v243_v23 = vsel %vm233_vm1, %v230_v18, 0.0  ;;  %v232_v24 = vld [vmem:[%s219_s6 + $0x38] sm:$0xff] }
  0x13   : > { %v245_v26 = vsel %vm233_vm1, %v231_v21, 0.0  ;;  %v247_v28 = vsel %vm233_vm1, %v232_v24, 0.0 }
  0x14   : > { %v238_v19 = vadd.f32 %v237_v14, %v236_v16 }
  0x16   : > { %v240_v22 = vadd.f32 %v239_v17, %v238_v19 }
  0x18   : > { %v242_v25 = vadd.f32 %v241_v20, %v240_v22 }
  0x1a   : > { %v244_v27 = vadd.f32 %v243_v23, %v242_v25 }
  0x1c   : > { %v246_v29 = vadd.f32 %v245_v26, %v244_v27 }
  0x1e   : > { %v248_v30 = vadd.f32 %v247_v28, %v246_v29 }
  0x20   : > { %v249_v31 = vrot.slane %v248_v30, 4 }
  0x22   : > { %v250_v32 = vadd.f32 %v249_v31, %v248_v30 }
  0x24   : > { %v251_v33 = vrot.slane %v250_v32, 2 }
  0x26   : > { %v252_v34 = vadd.f32 %v251_v33, %v250_v32 }
  0x28   : > { %v253_v35 = vrot.slane %v252_v34, 1 }
  0x2a   : > { %v254_v36 = vadd.f32 %v253_v35, %v252_v34 }
  0x2c   : > { %v255_v37 = vmul.f32 0.015625, %v254_v36 }
  0x2e   : > { %529 = vmatmul.mubr.msk.f32.vlgmr.msra.gmra.mrb[0].mxu0 %vm233_vm1, %v255_v37 }
 0x101   : > { %v330_v40 = vpop.f32.mrb[0].mxu0 }
 0x102   : > { %v331_v41 = vadd.f32 %v330_v40, %v260_v39  ;;  %v530_v42 = vpop.f32.mrb[1].mxu0 }
 0x104   : > { %v334_v43 = vmax.f32 %v331_v41, 0.0 }
 0x106   : > { %534 = vmatmul.mubr.msk.f32.vlgmr.msra.gmra.mrb[0].mxu1 %vm337_vm3, %v334_v43 }
 0x1d9   : > { %v411_v45 = vpop.f32.mrb[0].mxu1 }
 0x1da   : > { %v412_v46 = vadd.f32 %v411_v45, %v336_v44  ;;  %v535_v47 = vpop.f32.mrb[1].mxu1 }
 0x1dc   : > { %v508_v48 = vmul.f32 -1.442695, %v412_v46 }
 0x1de   : > { %553 = vpow2.f32 %v508_v48 }
 0x1e8   : > { %v554_v49 = vpop.eup %553 }
 0x1e9   : > { %v418_v50 = vadd.f32 1.0, %v554_v49 }
 0x1eb   : > { %555 = vrcp.f32 %v418_v50 }
 0x1f5   : > { %v556_v54 = vpop.eup %555 }
 0x1f6   : > { %v424_v55 = vrot.slane %v556_v54, %v423_v53 }
 0x1f8   : > { %v425_v56 = vmul.f32 %v424_v55, %v225_v8  ;;  %v426_v57 = vmul.f32 %v424_v55, %v226_v9  ;;  %v427_v58 = vmul.f32 %v424_v55, %v227_v10  ;;  %v428_v59 = vmul.f32 %v424_v55, %v228_v11 }
 0x1f9   : > { %v429_v60 = vmul.f32 %v424_v55, %v229_v15  ;;  %v430_v61 = vmul.f32 %v424_v55, %v230_v18  ;;  %v431_v62 = vmul.f32 %v424_v55, %v231_v21  ;;  %v432_v63 = vmul.f32 %v424_v55, %v232_v24 }
 0x1fa   : > { %433 = vst.msk [vmem:[%s224_s15] sm:$0xff] %vm233_vm1, %v425_v56  ;;  %434 = vst.msk [vmem:[%s224_s15 + $0x8] sm:$0xff] %vm233_vm1, %v426_v57 }
 0x1fb   : > { %435 = vst.msk [vmem:[%s224_s15 + $0x10] sm:$0xff] %vm233_vm1, %v427_v58  ;;  %436 = vst.msk [vmem:[%s224_s15 + $0x18] sm:$0xff] %vm233_vm1, %v428_v59 }
 0x1fc   : > { %437 = vst.msk [vmem:[%s224_s15 + $0x20] sm:$0xff] %vm233_vm1, %v429_v60  ;;  %438 = vst.msk [vmem:[%s224_s15 + $0x28] sm:$0xff] %vm233_vm1, %v430_v61 }
 0x1fd   : > { %439 = vst.msk [vmem:[%s224_s15 + $0x30] sm:$0xff] %vm233_vm1, %v431_v62  ;;  %440 = vst.msk [vmem:[%s224_s15 + $0x38] sm:$0xff] %vm233_vm1, %v432_v63 }
 0x1fe PF: > { %s15_s18 = sadd.s32 1, %s563_s18  }
 0x1ff   : > { %p12_p4 = scmp.ge.s32.totalorder %s15_s18, 4  }
 0x201   :  { %14 = sbr.rel (!%p12_p4) target bundleno = 1 (0x1), region = 70 }

</bundles_post_ra>
